<compile_context>
chip_gen: v5e
topology: v5e:2x2
jax: 0.10.0
libtpu: 0.0.40
codegen_flags: <defaults>
</compile_context>

<pallas_src>
import numpy as np

import jax
import jax.numpy as jnp
from jax.experimental import pallas as pl
from jax.experimental.pallas import tpu as pltpu


def _round_up(x, m):
    return ((x + m - 1) // m) * m


def _joint_counts_kernel(onehot_ref, probs_ref, out_ref):
    # out_ref is the (G*b, K*c+1) accumulator for the current parallel chunk; it
    # stays VMEM-resident across the inner (reduction) grid axis.
    @pl.when(pl.program_id(1) == 0)
    def _():
        out_ref[...] = jnp.zeros_like(out_ref)

    out_ref[...] += jnp.dot(
        onehot_ref[...], probs_ref[...], preferred_element_type=jnp.float32
    )


def _joint_counts(onehot_T, probs_aug, *, gb, ncols, n_pad, tile_n, num_chunks):
    tiles_per_chunk = n_pad // (num_chunks * tile_n)

    kernel = pl.pallas_call(
        _joint_counts_kernel,
        out_shape=jax.ShapeDtypeStruct((num_chunks, gb, ncols), jnp.float32),
        grid_spec=pltpu.PrefetchScalarGridSpec(
            num_scalar_prefetch=0,
            grid=(num_chunks, tiles_per_chunk),
            in_specs=[
                # combined one-hot: (G*b, n) -- resident sublane dim, tiled along lanes
                pl.BlockSpec((gb, tile_n),
                             lambda ch, t: (0, ch * tiles_per_chunk + t)),
                # probs with K folded into lanes (+ ones column): tiled along samples
                pl.BlockSpec((tile_n, ncols),
                             lambda ch, t: (ch * tiles_per_chunk + t, 0)),
            ],
            # one output slab per parallel chunk; constant across the reduction axis
            out_specs=pl.BlockSpec((None, gb, ncols), lambda ch, t: (ch, 0, 0)),
        ),
        compiler_params=pltpu.CompilerParams(
            dimension_semantics=("parallel", "arbitrary"),
            vmem_limit_bytes=32 * 1024 * 1024,
        ),
        cost_estimate=pl.CostEstimate(
            flops=2 * gb * n_pad * ncols,
            transcendentals=0,
            bytes_accessed=4 * (gb * n_pad + n_pad * ncols + num_chunks * gb * ncols),
        ),
    )
    return kernel(onehot_T, probs_aug)


def independence_loss_label(assignments, probabilities, condition, batch,
                            scaler=1.0, *, tile_n=512):
    """Pallas implementation of IndependenceLoss_label.forward."""
    if isinstance(probabilities, (list, tuple)):
        probs = jnp.stack(list(probabilities), axis=0)
    else:
        probs = jnp.asarray(probabilities)
    probs = probs.astype(jnp.float32)
    K, n, c = probs.shape

    # --- host-side resolution of data-dependent shapes (single transfer) ---
    a_np, cond_np, batch_np = (np.asarray(x) for x in
                               jax.device_get((assignments, condition, batch)))
    keys = np.stack([cond_np.astype(np.int64), batch_np.astype(np.int64)], axis=1)
    _, group_id = np.unique(keys, axis=0, return_inverse=True)
    group_id = group_id.reshape(-1)
    num_groups = int(group_id.max()) + 1
    # Global b (assignments.max()+1).  The reference uses sub_assignments.max()+1 per
    # subset; the extra all-zero categories contribute exactly 0 to every entropy and
    # normalization sum, so the result is identical.
    b = int(a_np.max()) + 1
    gb = num_groups * b
    ncols = K * c + 1  # trailing ones column -> per-(group, assignment) counts

    # --- sample-axis padding / chunking (contraction axis of the matmul) ---
    if n <= tile_n:
        num_chunks = 1
        n_pad = tile_n
    else:
        num_chunks = 2  # lets the "parallel" axis shard across 2 TCs on v7x
        n_pad = _round_up(n, num_chunks * tile_n)

    # Combined (group, assignment) one-hot laid out (G*b, n): samples on lanes.
    combo = (group_id.astype(np.int64) * b + a_np.astype(np.int64)).astype(np.int32)
    combo_pad = np.full((n_pad,), -1, dtype=np.int32)   # -1 -> all-zero column
    combo_pad[:n] = combo
    onehot_T = jax.nn.one_hot(jnp.asarray(combo_pad), gb,
                              dtype=jnp.float32, axis=0)          # (gb, n_pad)

    # Probabilities with K folded into the lane dimension, plus a ones column.
    p_flat = jnp.transpose(probs, (1, 0, 2)).reshape(n, K * c)     # (n, K*c)
    p_aug = jnp.concatenate([p_flat, jnp.ones((n, 1), jnp.float32)], axis=1)
    p_aug = jnp.pad(p_aug, ((0, n_pad - n), (0, 0)))               # (n_pad, ncols)

    partial = _joint_counts(onehot_T, p_aug, gb=gb, ncols=ncols, n_pad=n_pad,
                            tile_n=tile_n, num_chunks=num_chunks)
    counts = jnp.sum(partial, axis=0)                              # (gb, ncols)

    # --- tiny O(G*b*K*c) entropy / MI math in plain JAX ---
    eps = 1e-10
    joint_counts = counts[:, : K * c].reshape(num_groups, b, K, c)
    pa_counts = counts[:, K * c].reshape(num_groups, b)

    joint = jnp.transpose(joint_counts, (0, 2, 1, 3))              # (G, K, b, c)
    joint = joint / jnp.sum(joint, axis=(-1, -2), keepdims=True)
    p_a = pa_counts / jnp.sum(pa_counts, axis=-1, keepdims=True)   # (G, b)
    pb_counts = jnp.sum(joint_counts, axis=1)                      # (G, K, c)
    p_b = pb_counts / jnp.sum(pb_counts, axis=-1, keepdims=True)

    h_a = -jnp.sum(p_a * jnp.log(p_a + eps), axis=-1)              # (G,)
    h_b = -jnp.sum(p_b * jnp.log(p_b + eps), axis=-1)              # (G, K)
    h_ab = -jnp.sum(joint * jnp.log(joint + eps), axis=(-1, -2))   # (G, K)

    ha = h_a[:, None]
    mi = jnp.mean(2.0 * (ha + h_b - h_ab) / (ha + h_b), axis=-1)   # (G,)
    return scaler * jnp.sum(mi) / num_groups


def independence_loss_label_ref(assignments, probabilities, condition, batch,
                                scaler=1.0):
    """NumPy port of the PyTorch forward (per-subset loop), for verification."""
    if isinstance(probabilities, (list, tuple)):
        probs = np.stack([np.asarray(jax.device_get(p), dtype=np.float64)
                          for p in probabilities], axis=0)
    else:
        probs = np.asarray(jax.device_get(probabilities), dtype=np.float64)
    a_np = np.asarray(jax.device_get(assignments))
    c_np = np.asarray(jax.device_get(condition))
    b_np = np.asarray(jax.device_get(batch))
    keys = np.unique(np.stack([c_np, b_np], axis=1), axis=0)
    eps = 1e-10
    total = 0.0
    for key in keys:
        mask = (c_np == key[0]) & (b_np == key[1])
        sub_a = a_np[mask]
        sub_p = probs[:, mask]
        if sub_a.size == 0:
            continue
        bb = int(sub_a.max()) + 1
        onehot = np.eye(bb, dtype=np.float64)[sub_a][None]          # (1, m, bb)
        joint = np.matmul(np.transpose(onehot, (0, 2, 1)), sub_p)   # (K, bb, c)
        joint = joint / joint.sum(axis=(-1, -2), keepdims=True)
        p_a = onehot.sum(axis=-2)
        p_a = p_a / p_a.sum(axis=-1, keepdims=True)
        p_b = sub_p.sum(axis=-2)
        p_b = p_b / p_b.sum(axis=-1, keepdims=True)
        h_a = -(p_a * np.log(p_a + eps)).sum(-1)
        h_b = -(p_b * np.log(p_b + eps)).sum(-1)
        h_ab = -(joint * np.log(joint + eps)).sum((-1, -2))
        total += float(np.mean(2.0 * (h_a + h_b - h_ab) / (h_a + h_b)))
    return scaler * total / len(keys)


if __name__ == "__main__":
    key = jax.random.PRNGKey(0)
    k_a, k_c, k_b, k_p = jax.random.split(key, 4)

    n, c, K = 1200, 10, 3        # samples, classes, number of probability matrices
    num_clusters = 5             # assignment values in [0, num_clusters)
    num_conditions, num_batches = 2, 2

    assignments = jax.random.randint(k_a, (n,), 0, num_clusters, dtype=jnp.int32)
    condition = jax.random.randint(k_c, (n,), 0, num_conditions, dtype=jnp.int32)
    batch = jax.random.randint(k_b, (n,), 0, num_batches, dtype=jnp.int32)
    probabilities = [
        jax.nn.softmax(jax.random.normal(jax.random.fold_in(k_p, i), (n, c)), axis=-1)
        for i in range(K)
    ]

    out = independence_loss_label(assignments, probabilities, condition, batch,
                                  scaler=1.0)
    out = jax.block_until_ready(out)

    ref = independence_loss_label_ref(assignments, probabilities, condition, batch,
                                      scaler=1.0)
    assert abs(float(out) - float(ref)) < 1e-3, (float(out), float(ref))

    print("KERNEL_OK")
</pallas_src>

<mosaic_0001>
module attributes {stable_mosaic.version = 11 : i64} {
  func.func @_joint_counts_kernel(%arg0: i32, %arg1: i32, %arg2: memref<20x512xf32, #tpu.memory_space<vmem>>, %arg3: memref<512x31xf32, #tpu.memory_space<vmem>>, %arg4: memref<1x20x31xf32, #tpu.memory_space<vmem>>) attributes {dimension_semantics = [#tpu.dimension_semantics<parallel>, #tpu.dimension_semantics<arbitrary>], iteration_bounds = array<i64: 2, 2>, scalar_prefetch = 0 : i64, scratch_operands = 0 : i64, tpu.core_type = #tpu.core_type<tc>, window_params = [{transform_indices = @transform_0, window_bounds = array<i64: 20, 512>}, {transform_indices = @transform_1, window_bounds = array<i64: 512, 31>}, {transform_indices = @transform_2, window_bounds = array<i64: 1, 20, 31>}]} {
    %c0_i32 = arith.constant 0 : i32
    %0 = arith.cmpi eq, %arg1, %c0_i32 : i32
    %1 = arith.extui %0 : i1 to i32
    %c0_i32_0 = arith.constant 0 : i32
    %2 = arith.cmpi ne, %1, %c0_i32_0 : i32
    scf.if %2 {
      %cst_10 = arith.constant 0.000000e+00 : f32
      %12 = vector.broadcast %cst_10 : f32 to vector<20x31xf32>
      %c0_11 = arith.constant 0 : index
      %c0_12 = arith.constant 0 : index
      %c0_13 = arith.constant 0 : index
      %13 = vector.load %arg4[%c0_11, %c0_12, %c0_13] : memref<1x20x31xf32, #tpu.memory_space<vmem>>, vector<1x20x31xf32>
      %14 = vector.shape_cast %13 : vector<1x20x31xf32> to vector<20x31xf32>
      %15 = vector.shape_cast %12 : vector<20x31xf32> to vector<1x20x31xf32>
      tpu.vector_store %arg4[%c0_11, %c0_12, %c0_13], %15 {strides = array<i32>} : memref<1x20x31xf32, #tpu.memory_space<vmem>>, vector<1x20x31xf32>,
    } else {
    }
    %c0 = arith.constant 0 : index
    %c0_1 = arith.constant 0 : index
    %c0_2 = arith.constant 0 : index
    %3 = vector.load %arg4[%c0, %c0_1, %c0_2] : memref<1x20x31xf32, #tpu.memory_space<vmem>>, vector<1x20x31xf32>
    %4 = vector.shape_cast %3 : vector<1x20x31xf32> to vector<20x31xf32>
    %c0_3 = arith.constant 0 : index
    %c0_4 = arith.constant 0 : index
    %5 = vector.load %arg2[%c0_3, %c0_4] : memref<20x512xf32, #tpu.memory_space<vmem>>, vector<20x512xf32>
    %c0_5 = arith.constant 0 : index
    %c0_6 = arith.constant 0 : index
    %6 = vector.load %arg3[%c0_5, %c0_6] : memref<512x31xf32, #tpu.memory_space<vmem>>, vector<512x31xf32>
    %cst = arith.constant dense<0.000000e+00> : vector<20x31xf32>
    %7 = tpu.matmul %5, %6, %cst {dimension_numbers = #tpu.dot_dimension_numbers<[1], [0], [0], [1], [0, 0, 1, 1], [], []>} : vector<20x512xf32>, vector<512x31xf32>, vector<20x31xf32> -> vector<20x31xf32>
    %8 = arith.addf %4, %7 : vector<20x31xf32>
    %c0_7 = arith.constant 0 : index
    %c0_8 = arith.constant 0 : index
    %c0_9 = arith.constant 0 : index
    %9 = vector.load %arg4[%c0_7, %c0_8, %c0_9] : memref<1x20x31xf32, #tpu.memory_space<vmem>>, vector<1x20x31xf32>
    %10 = vector.shape_cast %9 : vector<1x20x31xf32> to vector<20x31xf32>
    %11 = vector.shape_cast %8 : vector<20x31xf32> to vector<1x20x31xf32>
    tpu.vector_store %arg4[%c0_7, %c0_8, %c0_9], %11 {strides = array<i32>} : memref<1x20x31xf32, #tpu.memory_space<vmem>>, vector<1x20x31xf32>,
    return
  }
  func.func @transform_0(%arg0: i32, %arg1: i32) -> (i32, i32) {
    %c2_i32 = arith.constant 2 : i32
    %0 = arith.muli %arg0, %c2_i32 : i32
    %1 = arith.addi %0, %arg1 : i32
    %c0_i32 = arith.constant 0 : i32
    %c0_i32_0 = arith.constant 0 : i32
    return %c0_i32, %1 : i32, i32
  }
  func.func @transform_1(%arg0: i32, %arg1: i32) -> (i32, i32) {
    %c2_i32 = arith.constant 2 : i32
    %0 = arith.muli %arg0, %c2_i32 : i32
    %1 = arith.addi %0, %arg1 : i32
    %c0_i32 = arith.constant 0 : i32
    %c0_i32_0 = arith.constant 0 : i32
    return %1, %c0_i32 : i32, i32
  }
  func.func @transform_2(%arg0: i32, %arg1: i32) -> (i32, i32, i32) {
    %c0_i32 = arith.constant 0 : i32
    %c0_i32_0 = arith.constant 0 : i32
    %c0_i32_1 = arith.constant 0 : i32
    return %arg0, %c0_i32, %c0_i32_0 : i32, i32, i32
  }
}

</mosaic_0001>

<bundles_post_ra>
// kernel: tpu_custom_call.1
= control target key start
LH: loop header
LB: loop body
LE: loop exit
PB: predicated region body
PF: predicated region fallthrough
CT: control target
= control target key end

     0   :  { %s681_s9 = smov 0   ;;  %s683_s10 = smov 0   ;;  %s865_s0 = inlined_call_operand.vmem [shape: f32[20,2048], index: 0, kind: input, shape index: {}]   ;;  %s866_s1 = inlined_call_operand.vmem [shape: f32[2048,31], index: 1, kind: input, shape index: {}]   ;;  %s867_s2 = inlined_call_operand.vmem [shape: f32[2,20,31], index: 2, kind: output, shape index: {}]  }
   0x1   :  { %s685_s11 = smov 0   ;;  %s687_s12 = smov 0  }
   0x2   :  { %s689_s13 = smov 0   ;;  %s691_s14 = smov 0  }
   0x3   :  { %s693_s15 = smov 0  }
   0x4 LB: > { %s21_s16 = sadd.s32 1, %s655_s13  ;;  %s24_s17 = sadd.s32 1, %s659_s14  ;;  %s663_s15 = sphi %s693_s15, %s12_s15   ;;  %s659_s14 = sphi %s691_s14, %s873_s14   ;;  %s655_s13 = sphi %s689_s13, %s872_s13   ;;  %s651_s12 = sphi %s687_s12, %s871_s12   ;;  %s647_s11 = sphi %s685_s11, %s870_s11   ;;  %s643_s10 = sphi %s683_s10, %s869_s10   ;;  %s639_s9 = sphi %s681_s9, %s868_s9  }
   0x5   : > { %p22_p0 = scmp.ge.s32.totalorder %s21_s16, 2  ;;  %p42_p1 = scmp.ne.s32.totalorder %s643_s10, %s639_s9 }
   0x6   : > { %p43_p2 = scmp.eq.s32.totalorder %s663_s15, 0  ;;  %s531_s18 = sshll.u32 %s659_s14, 1 }
   0x7   : > { %s875_s16 = smov (%p22_p0, %s21_s16), 0  ;;  %s877_s17 = smov (!%p22_p0, %s24_s17), %s659_s14 }
   0x8   : > { %p26_p3 = scmp.ge.s32.totalorder %s877_s17, 2  ;;  %p44_p4 = por %p43_p2, %p42_p1 }
   0x9   : > { %s29_s19 = sadd.s32 %s655_s13, %s531_s18  ;;  %s35_s23 = sadd.s32 1, %s643_s10 }
   0xa   : > { %s879_s17 = smov (%p26_p3, %s877_s17), 0  ;;  %p536_p6 = scmp.ge.s32.totalorder %s663_s15, 4 }
   0xb   : > { %s532_s20 = sshll.u32 %s879_s17, 1 }
   0xc   : > { %s31_s21 = sadd.s32 %s532_s20, %s875_s16  ;;  %124 = sbr.rel (%p536_p6) target bundleno = 33 (0x21), region = 16 }
   0xd   : > { %s32_s22 = ssub.s32 %s29_s19, %s31_s21 }
   0xe   : > { %p33_p5 = scmp.eq.s32.totalorder %s32_s22, 0 }
  0x10   : > { %s732_s24 = scalar_select %p33_p5, %s643_s10, %s35_s23  }
  0x11   : > { %127 = sbr.rel (!%p44_p4) target bundleno = 33 (0x21), region = 20  ;;  %s129_s25 = sand.u32 (%p44_p4), 1, %s643_s10  }
  0x12   : > { %s548_s26 = sshll.u32 (%p44_p4), %s29_s19, 5  ;;  %s549_s27 = smul.u32 (%p44_p4), 96, %s129_s25 }
  0x13   : > { %s136_s30 = scalar_lea.vmem (%p44_p4), %s865_s0, %s548_s26 }
  0x14   : > { %v149_v0 = vld [vmem:[%s136_s30] sm:$0xff] (%p44_p4)  ;;  %v151_v1 = vld [vmem:[%s136_s30 + $0x8] sm:$0xff] (%p44_p4)  ;;  %v153_v2 = vld [vmem:[%s136_s30 + $0x10] sm:$0xff] (%p44_p4)  ;;  %s131_s3 = scalar_lea.vmem (%p44_p4), [#allocation2], %s549_s27 }
  0x15   : > { %150 = vst [vmem:[%s131_s3] sm:$0xff] (%p44_p4), %v149_v0  ;;  %v155_v3 = vld [vmem:[%s136_s30 + $0x18] sm:$0xff] (%p44_p4)  ;;  %v157_v4 = vld [vmem:[%s136_s30 + $0x80] sm:$0xff] (%p44_p4)  ;;  %v159_v5 = vld [vmem:[%s136_s30 + $0x88] sm:$0xff] (%p44_p4) }
  0x16   : > { %152 = vst [vmem:[%s131_s3 + $0x8] sm:$0xff] %v151_v1  ;;  %v161_v6 = vld [vmem:[%s136_s30 + $0x90] sm:$0xff]  ;;  %v163_v7 = vld [vmem:[%s136_s30 + $0x98] sm:$0xff]  ;;  %v165_v8 = vld [vmem:[%s136_s30 + $0x100] sm:$0xff] }
  0x17   : > { %154 = vst [vmem:[%s131_s3 + $0x10] sm:$0xff] %v153_v2  ;;  %v167_v9 = vld [vmem:[%s136_s30 + $0x108] sm:$0xff]  ;;  %v169_v10 = vld [vmem:[%s136_s30 + $0x110] sm:$0xff]  ;;  %v171_v11 = vld [vmem:[%s136_s30 + $0x118] sm:$0xff] }
  0x18   : > { %156 = vst [vmem:[%s131_s3 + $0x18] sm:$0xff] %v155_v3 }
  0x19   : > { %158 = vst [vmem:[%s131_s3 + $0x20] sm:$0xff] %v157_v4 }
  0x1a   : > { %160 = vst [vmem:[%s131_s3 + $0x28] sm:$0xff] %v159_v5 }
  0x1b   : > { %162 = vst [vmem:[%s131_s3 + $0x30] sm:$0xff] %v161_v6 }
  0x1c   : > { %164 = vst [vmem:[%s131_s3 + $0x38] sm:$0xff] %v163_v7 }
  0x1d   : > { %166 = vst [vmem:[%s131_s3 + $0x40] sm:$0xff] %v165_v8 }
  0x1e   : > { %168 = vst [vmem:[%s131_s3 + $0x48] sm:$0xff] %v167_v9 }
  0x1f   : > { %170 = vst [vmem:[%s131_s3 + $0x50] sm:$0xff] %v169_v10 }
  0x20   : > { %172 = vst [vmem:[%s131_s3 + $0x58] sm:$0xff] %v171_v11 }
  0x21 PF: > { %p540_p7 = scmp.ge.s32.totalorder %s663_s15, 1  ;;  %p190_p8 = scmp.lt.s32.totalorder %s663_s15, 5 }
  0x23   : > { %p191_p9 = pnand %p540_p7, %p190_p8 }
  0x24   : > { %s197_s4 = sand.u32 (!%p191_p9), 1, %s639_s9   ;;  %s541_s5 = sshll.u32 (!%p191_p9), %s651_s12, 1 }
  0x25   : > { %194 = sbr.rel (%p191_p9) target bundleno = 241 (0xf1), region = 47  ;;  %s229_s7 = sadd.s32 (!%p191_p9), %s647_s11, %s541_s5 }
  0x26   : > { %s550_s6 = smul.u32 (!%p191_p9), 96, %s197_s4  ;;  %s542_s8 = sshll.u32 (!%p191_p9), %s229_s7, 6 }
  0x27   : > { %p238_p10 = scmp.lt.s32.totalorder (!%p191_p9), %s651_s12, 1  ;;  %p231_p11 = scmp.lt.s32.totalorder (!%p191_p9), %s542_s8, 255 }
  0x28   : > { %s756_s9 = scalar_lea.vmem (!%p191_p9), [#allocation2], %s550_s6  ;;  %p545_p12 = scmp.ne.s32.totalorder (!%p191_p9), %s647_s11, 0 }
  0x2a   : > { %s881_s12 = smov (!%p238_p10, %s651_s12), 1  ;;  %s883_s8 = smov (!%p231_p11, %s542_s8), 255 }
  0x2b   : > { %s551_s18 = smul.u32 24, %s881_s12  ;;  %s543_s19 = sshll.u32 %s883_s8, 3 }
  0x2c   : > { %s749_s22 = scalar_lea.vmem %s866_s1, %s543_s19  ;;  %246 = sbr.rel (%p545_p12) target bundleno = 53 (0x35), region = 55 }
  0x2d   : > { %s754_s26 = scalar_lea.vmem %s867_s2, %s551_s18 }
  0x31   : > { %vm247_vm0 = vcmask 252928   ;;  %vm250_vm1 = vcmask 248832   ;;  %v665_v12 = vmov 0.0  }
  0x32   : > { %248 = vst.msk [vmem:[%s754_s26] sm:$0xff] %vm247_vm0, %v665_v12 }
  0x33   : > { %249 = vst.msk [vmem:[%s754_s26 + $0x8] sm:$0xff] %vm247_vm0, %v665_v12 }
  0x34   : > { %251 = vst.msk [vmem:[%s754_s26 + $0x10] sm:$0xf] %vm250_vm1, %v665_v12 }
  0x35 PF: > { %v314_v13 = vld [vmem:[%s749_s22 + $0x178] sm:$0xff]  ;;  %v313_v14 = vld [vmem:[%s749_s22 + $0x170] sm:$0xff]  ;;  %v312_v18 = vld [vmem:[%s749_s22 + $0x168] sm:$0xff]  ;;  %vm438_vm2 = vcmask 252928   ;;  %vm441_vm3 = vcmask 248832  }
  0x36   : > { %v330_v15 = vld [vmem:[%s749_s22 + $0x1f8] sm:$0xff]  ;;  %383 = vmatpush.msra.mxu2 %v314_v13  ;;  %v329_v19 = vld [vmem:[%s749_s22 + $0x1f0] sm:$0xff]  ;;  %v328_v22 = vld [vmem:[%s749_s22 + $0x1e8] sm:$0xff] }
  0x37   : > { %409 = vmatpush.msra.mxu3 %v330_v15  ;;  %v282_v16 = vld [vmem:[%s749_s22 + $0x78] sm:$0xff]  ;;  %v281_v20 = vld [vmem:[%s749_s22 + $0x70] sm:$0xff]  ;;  %v280_v23 = vld [vmem:[%s749_s22 + $0x68] sm:$0xff] }
  0x38   : > { %v298_v17 = vld [vmem:[%s749_s22 + $0xf8] sm:$0xff]  ;;  %331 = vmatpush.msra.mxu0 %v282_v16  ;;  %v297_v21 = vld [vmem:[%s749_s22 + $0xf0] sm:$0xff]  ;;  %384 = vmatpush.msra.mxu2 %v313_v14  ;;  %v311_v24 = vld [vmem:[%s749_s22 + $0x160] sm:$0xff] }
  0x39   : > { %357 = vmatpush.msra.mxu1 %v298_v17  ;;  %410 = vmatpush.msra.mxu3 %v329_v19  ;;  %v296_v25 = vld [vmem:[%s749_s22 + $0xe8] sm:$0xff]  ;;  %v327_v26 = vld [vmem:[%s749_s22 + $0x1e0] sm:$0xff]  ;;  %v310_v29 = vld [vmem:[%s749_s22 + $0x158] sm:$0xff] }
  0x3a   : > { %332 = vmatpush.msra.mxu0 %v281_v20  ;;  %385 = vmatpush.msra.mxu2 %v312_v18  ;;  %v279_v27 = vld [vmem:[%s749_s22 + $0x60] sm:$0xff]  ;;  %v326_v30 = vld [vmem:[%s749_s22 + $0x1d8] sm:$0xff]  ;;  %v309_v33 = vld [vmem:[%s749_s22 + $0x150] sm:$0xff] }
  0x3b   : > { %358 = vmatpush.msra.mxu1 %v297_v21  ;;  %411 = vmatpush.msra.mxu3 %v328_v22  ;;  %v295_v28 = vld [vmem:[%s749_s22 + $0xe0] sm:$0xff]  ;;  %v278_v31 = vld [vmem:[%s749_s22 + $0x58] sm:$0xff]  ;;  %v325_v34 = vld [vmem:[%s749_s22 + $0x1d0] sm:$0xff] }
  0x3c   : > { %333 = vmatpush.msra.mxu0 %v280_v23  ;;  %386 = vmatpush.msra.mxu2 %v311_v24  ;;  %v294_v32 = vld [vmem:[%s749_s22 + $0xd8] sm:$0xff]  ;;  %v277_v35 = vld [vmem:[%s749_s22 + $0x50] sm:$0xff]  ;;  %v308_v37 = vld [vmem:[%s749_s22 + $0x148] sm:$0xff] }
  0x3d   : > { %359 = vmatpush.msra.mxu1 %v296_v25  ;;  %412 = vmatpush.msra.mxu3 %v327_v26  ;;  %v293_v36 = vld [vmem:[%s749_s22 + $0xd0] sm:$0xff]  ;;  %v324_v38 = vld [vmem:[%s749_s22 + $0x1c8] sm:$0xff]  ;;  %v307_v41 = vld [vmem:[%s749_s22 + $0x140] sm:$0xff] }
  0x3e   : > { %334 = vmatpush.msra.mxu0 %v279_v27  ;;  %387 = vmatpush.msra.mxu2 %v310_v29  ;;  %v276_v39 = vld [vmem:[%s749_s22 + $0x48] sm:$0xff]  ;;  %v323_v42 = vld [vmem:[%s749_s22 + $0x1c0] sm:$0xff]  ;;  %v306_v45 = vld [vmem:[%s749_s22 + $0x138] sm:$0xff] }
  0x3f   : > { %360 = vmatpush.msra.mxu1 %v295_v28  ;;  %413 = vmatpush.msra.mxu3 %v326_v30  ;;  %v292_v40 = vld [vmem:[%s749_s22 + $0xc8] sm:$0xff]  ;;  %v275_v43 = vld [vmem:[%s749_s22 + $0x40] sm:$0xff]  ;;  %v322_v46 = vld [vmem:[%s749_s22 + $0x1b8] sm:$0xff] }
  0x40   : > { %335 = vmatpush.msra.mxu0 %v278_v31  ;;  %388 = vmatpush.msra.mxu2 %v309_v33  ;;  %v291_v44 = vld [vmem:[%s749_s22 + $0xc0] sm:$0xff]  ;;  %v274_v47 = vld [vmem:[%s749_s22 + $0x38] sm:$0xff]  ;;  %v305_v49 = vld [vmem:[%s749_s22 + $0x130] sm:$0xff] }
  0x41   : > { %361 = vmatpush.msra.mxu1 %v294_v32  ;;  %414 = vmatpush.msra.mxu3 %v325_v34  ;;  %v290_v48 = vld [vmem:[%s749_s22 + $0xb8] sm:$0xff]  ;;  %v321_v50 = vld [vmem:[%s749_s22 + $0x1b0] sm:$0xff]  ;;  %v304_v53 = vld [vmem:[%s749_s22 + $0x128] sm:$0xff] }
  0x42   : > { %336 = vmatpush.msra.mxu0 %v277_v35  ;;  %389 = vmatpush.msra.mxu2 %v308_v37  ;;  %v273_v51 = vld [vmem:[%s749_s22 + $0x30] sm:$0xff]  ;;  %v320_v54 = vld [vmem:[%s749_s22 + $0x1a8] sm:$0xff]  ;;  %v303_v57 = vld [vmem:[%s749_s22 + $0x120] sm:$0xff] }
  0x43   : > { %362 = vmatpush.msra.mxu1 %v293_v36  ;;  %415 = vmatpush.msra.mxu3 %v324_v38  ;;  %v289_v52 = vld [vmem:[%s749_s22 + $0xb0] sm:$0xff]  ;;  %v272_v55 = vld [vmem:[%s749_s22 + $0x28] sm:$0xff]  ;;  %v319_v58 = vld [vmem:[%s749_s22 + $0x1a0] sm:$0xff] }
  0x44   : > { %337 = vmatpush.msra.mxu0 %v276_v39  ;;  %390 = vmatpush.msra.mxu2 %v307_v41  ;;  %v288_v56 = vld [vmem:[%s749_s22 + $0xa8] sm:$0xff]  ;;  %v271_v59 = vld [vmem:[%s749_s22 + $0x20] sm:$0xff]  ;;  %v302_v61 = vld [vmem:[%s749_s22 + $0x118] sm:$0xff] }
  0x45   : > { %363 = vmatpush.msra.mxu1 %v292_v40  ;;  %416 = vmatpush.msra.mxu3 %v323_v42  ;;  %v287_v60 = vld [vmem:[%s749_s22 + $0xa0] sm:$0xff]  ;;  %v318_v62 = vld [vmem:[%s749_s22 + $0x198] sm:$0xff]  ;;  %v301_v1 = vld [vmem:[%s749_s22 + $0x110] sm:$0xff] }
  0x46   : > { %338 = vmatpush.msra.mxu0 %v275_v43  ;;  %391 = vmatpush.msra.mxu2 %v306_v45  ;;  %v270_v63 = vld [vmem:[%s749_s22 + $0x18] sm:$0xff]  ;;  %v317_v2 = vld [vmem:[%s749_s22 + $0x190] sm:$0xff]  ;;  %v300_v5 = vld [vmem:[%s749_s22 + $0x108] sm:$0xff] }
  0x47   : > { %364 = vmatpush.msra.mxu1 %v291_v44  ;;  %417 = vmatpush.msra.mxu3 %v322_v46  ;;  %v286_v0 = vld [vmem:[%s749_s22 + $0x98] sm:$0xff]  ;;  %v269_v3 = vld [vmem:[%s749_s22 + $0x10] sm:$0xff]  ;;  %v316_v6 = vld [vmem:[%s749_s22 + $0x188] sm:$0xff] }
  0x48   : > { %339 = vmatpush.msra.mxu0 %v274_v47  ;;  %392 = vmatpush.msra.mxu2 %v305_v49  ;;  %v285_v4 = vld [vmem:[%s749_s22 + $0x90] sm:$0xff]  ;;  %v268_v7 = vld [vmem:[%s749_s22 + $0x8] sm:$0xff]  ;;  %v299_v9 = vld [vmem:[%s749_s22 + $0x100] sm:$0xff] }
  0x49   : > { %365 = vmatpush.msra.mxu1 %v290_v48  ;;  %418 = vmatpush.msra.mxu3 %v321_v50  ;;  %v284_v8 = vld [vmem:[%s749_s22 + $0x88] sm:$0xff]  ;;  %v315_v10 = vld [vmem:[%s749_s22 + $0x180] sm:$0xff]  ;;  %v257_v11 = vld [vmem:[%s756_s9 + $0x10] sm:$0xff] }
  0x4a   : > { %340 = vmatpush.msra.mxu0 %v273_v51  ;;  %393 = vmatpush.msra.mxu2 %v304_v53  ;;  %v258_v12 = vld [vmem:[%s756_s9 + $0x18] sm:$0xff]  ;;  %v267_v13 = vld [vmem:[%s749_s22] sm:$0xff]  ;;  %v256_v16 = vld [vmem:[%s756_s9 + $0x8] sm:$0xff] }
  0x4b   : > { %366 = vmatpush.msra.mxu1 %v289_v52  ;;  %419 = vmatpush.msra.mxu3 %v320_v54  ;;  %v283_v14 = vld [vmem:[%s749_s22 + $0x80] sm:$0xff]  ;;  %v261_v17 = vld [vmem:[%s756_s9 + $0x30] sm:$0xff]  ;;  %v262_v18 = vld [vmem:[%s756_s9 + $0x38] sm:$0xff] }
  0x4c   : > { %341 = vmatpush.msra.mxu0 %v272_v55  ;;  %394 = vmatpush.msra.mxu2 %v303_v57  ;;  %v255_v15 = vld [vmem:[%s756_s9] sm:$0xff]  ;;  %v260_v20 = vld [vmem:[%s756_s9 + $0x28] sm:$0xff]  ;;  %v265_v21 = vld [vmem:[%s756_s9 + $0x50] sm:$0xf] }
  0x4d   : > { %367 = vmatpush.msra.mxu1 %v288_v56  ;;  %420 = vmatpush.msra.mxu3 %v319_v58  ;;  %v259_v19 = vld [vmem:[%s756_s9 + $0x20] sm:$0xff]  ;;  %v266_v22 = vld [vmem:[%s756_s9 + $0x58] sm:$0xf]  ;;  %v264_v24 = vld [vmem:[%s756_s9 + $0x48] sm:$0xf] }
  0x4e   : > { %342 = vmatpush.msra.mxu0 %v271_v59  ;;  %395 = vmatpush.msra.mxu2 %v302_v61  ;;  %v263_v23 = vld [vmem:[%s756_s9 + $0x40] sm:$0xf]  ;;  %v253_v40 = vld [vmem:[%s754_s26 + $0x8] sm:$0xff]  ;;  %v254_v49 = vld [vmem:[%s754_s26 + $0x10] sm:$0xf] }
  0x4f   : > { %368 = vmatpush.msra.mxu1 %v287_v60  ;;  %421 = vmatpush.msra.mxu3 %v318_v62  ;;  %v252_v31 = vld [vmem:[%s754_s26] sm:$0xff] }
  0x50   : > { %343 = vmatpush.msra.mxu0 %v270_v63  ;;  %396 = vmatpush.msra.mxu2 %v301_v1 }
  0x51   : > { %369 = vmatpush.msra.mxu1 %v286_v0  ;;  %422 = vmatpush.msra.mxu3 %v317_v2 }
  0x52   : > { %344 = vmatpush.msra.mxu0 %v269_v3  ;;  %397 = vmatpush.msra.mxu2 %v300_v5 }
  0x53   : > { %370 = vmatpush.msra.mxu1 %v285_v4  ;;  %423 = vmatpush.msra.mxu3 %v316_v6 }
  0x54   : > { %345 = vmatpush.msra.mxu0 %v268_v7  ;;  %398 = vmatpush.msra.mxu2 %v299_v9 }
  0x55   : > { %371 = vmatpush.msra.mxu1 %v284_v8  ;;  %424 = vmatpush.msra.mxu3 %v315_v10 }
  0x56   : > { %399 = vmatmul.f32.vlgmr.msra.gmra.mxu2 %v257_v11  ;;  %425 = vmatmul.f32.vlgmr.msra.gmra.mxu3 %v258_v12 }
  0x57   : > { %346 = vmatpush.msra.mxu0 %v267_v13  ;;  %372 = vmatpush.msra.mxu1 %v283_v14 }
  0x58   : > { %347 = vmatmul.f32.vlgmr.msra.gmra.mxu0 %v255_v15  ;;  %373 = vmatmul.f32.vlgmr.msra.gmra.mxu1 %v256_v16 }
  0x5e   : > { %402 = vmatmul.f32.gmra.mxu2 %v261_v17  ;;  %428 = vmatmul.f32.gmra.mxu3 %v262_v18 }
  0x60   : > { %350 = vmatmul.f32.gmra.mxu0 %v259_v19  ;;  %376 = vmatmul.f32.gmra.mxu1 %v260_v20 }
  0x66   : > { %405 = vmatmul.f32.gmra.mxu2 %v265_v21  ;;  %431 = vmatmul.f32.gmra.mxu3 %v266_v22 }
  0x68   : > { %353 = vmatmul.f32.gmra.mxu0 %v263_v23  ;;  %379 = vmatmul.f32.gmra.mxu1 %v264_v24 }
  0xd5   : > { %v348_v25 = vpop.f32.mrf.mxu0  ;;  %v374_v26 = vpop.f32.mrf.mxu1 }
  0xd6   : > { %v375_v27 = vadd.f32 %v374_v26, %v348_v25 }
  0xd9   : > { %v400_v28 = vpop.f32.mrf.mxu2  ;;  %v426_v29 = vpop.f32.mrf.mxu3 }
  0xda   : > { %v401_v30 = vadd.f32 %v400_v28, %v375_v27 }
  0xdc   : > { %v427_v32 = vadd.f32 %v426_v29, %v401_v30 }
  0xdd   : > { %v351_v33 = vpop.f32.mrf.mxu0  ;;  %v377_v34 = vpop.f32.mrf.mxu1 }
  0xde   : > { %v435_v35 = vadd.f32 %v427_v32, %v252_v31  ;;  %v378_v36 = vadd.f32 %v377_v34, %v351_v33 }
  0xe0   : > { %439 = vst.msk [vmem:[%s754_s26] sm:$0xff] %vm438_vm2, %v435_v35 }
  0xe1   : > { %v403_v37 = vpop.f32.mrf.mxu2  ;;  %v429_v38 = vpop.f32.mrf.mxu3 }
  0xe2   : > { %v404_v39 = vadd.f32 %v403_v37, %v378_v36 }
  0xe4   : > { %v430_v41 = vadd.f32 %v429_v38, %v404_v39 }
  0xe5   : > { %v354_v42 = vpop.f32.mrf.mxu0  ;;  %v380_v43 = vpop.f32.mrf.mxu1 }
  0xe6   : > { %v436_v44 = vadd.f32 %v430_v41, %v253_v40  ;;  %v381_v45 = vadd.f32 %v380_v43, %v354_v42 }
  0xe8   : > { %440 = vst.msk [vmem:[%s754_s26 + $0x8] sm:$0xff] %vm438_vm2, %v436_v44 }
  0xe9   : > { %v406_v46 = vpop.f32.mrf.mxu2  ;;  %v432_v47 = vpop.f32.mrf.mxu3 }
  0xea   : > { %v407_v48 = vadd.f32 %v406_v46, %v381_v45 }
  0xec   : > { %v433_v50 = vadd.f32 %v432_v47, %v407_v48 }
  0xee   : > { %v437_v51 = vadd.f32 %v433_v50, %v254_v49 }
  0xf0   : > { %442 = vst.msk [vmem:[%s754_s26 + $0x10] sm:$0xf] %vm441_vm3, %v437_v51 }
  0xf1 PF: > { %s12_s15 = sadd.s32 1, %s663_s15   ;;  %s868_s9 = smov %s643_s10 }
  0xf2   : > { %p9_p13 = scmp.ge.s32.totalorder %s12_s15, 6   ;;  %s869_s10 = smov %s732_s24 }
  0xf3   : > { %s870_s11 = smov %s655_s13  ;;  %s871_s12 = smov %s659_s14 }
  0xf4   : > { %s872_s13 = smov %s875_s16  ;;  %s873_s14 = smov %s879_s17 }
  0xf5   :  { %11 = sbr.rel (!%p9_p13) target bundleno = 4 (0x4), region = 93 }

</bundles_post_ra>
